<compile_context>
chip_gen: v5e
topology: v5e:2x2
jax: 0.10.0
libtpu: 0.0.40
codegen_flags: <defaults>
</compile_context>

<pallas_src>
import math

import jax
import jax.numpy as jnp
from jax import lax
from jax.experimental import pallas as pl
from jax.experimental.pallas import tpu as pltpu

_EPS = 1e-6
_LANES = 128
_CHUNK_ROWS = 512            # strip-mine chunk: 512x128 f32 = 256 KiB / operand


def _round_up(x, m):
    return ((x + m - 1) // m) * m


def _make_reduce_kernel(tile_rows, chunk_rows, n_valid, n_steps):
    """Per-(batch, row-tile) reduction kernel.

    Grid = (B, n_steps).  The (1, 3, 8, 128) output block is resident across
    the reduction axis (its index_map ignores the step) and holds per-lane
    partial sums of [intersection, cardinality, sum-squared-error].
    """
    n_chunks = tile_rows // chunk_rows
    # True iff the grid covers exactly the valid elements -> no masking needed.
    covers_exactly = (n_steps * tile_rows * _LANES) == n_valid

    def kernel(pred_ref, targ_ref, acc_ref):
        step = pl.program_id(1)

        @pl.when(step == 0)
        def _():
            acc_ref[...] = jnp.zeros_like(acc_ref)

        def fold(x):
            # (chunk_rows, 128) -> (chunk_rows//8, 8, 128) -> sum axis 0:
            # pure vreg+vreg VPU adds, no cross-lane reduce.
            return jnp.sum(x.reshape(chunk_rows // 8, 8, _LANES), axis=0)

        def chunk_body(masked):
            def body(c, carry):
                ai, ac, ae = carry
                r0 = pl.multiple_of(c * chunk_rows, chunk_rows)
                p = pred_ref[0, pl.ds(r0, chunk_rows), :].astype(jnp.float32)
                t = targ_ref[0, pl.ds(r0, chunk_rows), :].astype(jnp.float32)
                if masked:
                    # Global flat element index of each (row, lane) position.
                    # (n_valid < 2^31 per batch row is assumed.)
                    grow = (step * tile_rows + c * chunk_rows
                            + lax.broadcasted_iota(
                                jnp.int32, (chunk_rows, _LANES), 0))
                    lane = lax.broadcasted_iota(
                        jnp.int32, (chunk_rows, _LANES), 1)
                    valid = grow * _LANES + lane < n_valid
                    p = jnp.where(valid, p, 0.0)
                    t = jnp.where(valid, t, 0.0)
                # sigmoid(x) = 0.5*tanh(x/2) + 0.5 : single EUP op per element.
                s = 0.5 * jnp.tanh(0.5 * p) + 0.5
                if masked:
                    s = jnp.where(valid, s, 0.0)
                d = p - t
                return (ai + fold(s * t),    # intersection
                        ac + fold(s + t),    # cardinality
                        ae + fold(d * d))    # sum of squared error
            return body

        def run(masked):
            z = jnp.zeros((8, _LANES), jnp.float32)
            ai, ac, ae = lax.fori_loop(0, n_chunks, chunk_body(masked),
                                       (z, z, z), unroll=(n_chunks <= 8))
            acc_ref[0, 0, :, :] = acc_ref[0, 0, :, :] + ai
            acc_ref[0, 1, :, :] = acc_ref[0, 1, :, :] + ac
            acc_ref[0, 2, :, :] = acc_ref[0, 2, :, :] + ae

        if covers_exactly:
            run(masked=False)
        else:
            @pl.when(step < n_steps - 1)
            def _():
                run(masked=False)

            @pl.when(step == n_steps - 1)
            def _():
                run(masked=True)

    return kernel


def mse_dice_loss(pred, target, *, max_tile_rows=4096):
    """Equivalent of MSEDiceLoss.forward(pred, target) -> scalar f32."""
    assert pred.shape == target.shape
    B = pred.shape[0]
    N = math.prod(pred.shape[1:])

    # Native sublane multiple for the narrowest input dtype (8 f32 / 16 bf16).
    def _sub(x):
        return {4: 8, 2: 16, 1: 32}.get(jnp.dtype(x.dtype).itemsize, 8)
    sub = max(_sub(pred), _sub(target))

    rows = pl.cdiv(N, _LANES)
    cols_pad = rows * _LANES - N          # < 128; only when N not lane-aligned
    rows_sub = _round_up(rows, sub)

    max_tile_rows = _round_up(max_tile_rows, _CHUNK_ROWS)
    if rows_sub <= _CHUNK_ROWS:
        tile_rows = rows_sub
        chunk_rows = rows_sub
    else:
        tile_rows = min(max_tile_rows, _CHUNK_ROWS * (rows_sub // _CHUNK_ROWS))
        chunk_rows = _CHUNK_ROWS
    n_steps = pl.cdiv(rows, tile_rows)

    def prep(x):
        x2 = x.reshape(B, N)               # free reshape (dim merge)
        if cols_pad:
            # Tiny (<128 elems/row) pad only when N % 128 != 0; the padded
            # lanes are masked out in-kernel, so no post-hoc correction.
            x2 = jnp.pad(x2, ((0, 0), (0, cols_pad)))
        return x2.reshape(B, rows, _LANES)

    p3 = prep(pred)
    t3 = prep(target)

    kernel = _make_reduce_kernel(tile_rows, chunk_rows, N, n_steps)

    acc = pl.pallas_call(
        kernel,
        out_shape=jax.ShapeDtypeStruct((B, 3, 8, _LANES), jnp.float32),
        grid_spec=pltpu.PrefetchScalarGridSpec(
            num_scalar_prefetch=0,
            grid=(B, n_steps),
            in_specs=[
                pl.BlockSpec((1, tile_rows, _LANES), lambda b, n: (b, n, 0)),
                pl.BlockSpec((1, tile_rows, _LANES), lambda b, n: (b, n, 0)),
            ],
            out_specs=pl.BlockSpec(
                (1, 3, 8, _LANES), lambda b, n: (b, 0, 0, 0)),
        ),
        compiler_params=pltpu.CompilerParams(
            dimension_semantics=("parallel", "arbitrary"),
            vmem_limit_bytes=40 * 1024 * 1024),
    )(p3, t3)

    # Final (tiny) cross-lane + scalar combine in plain JAX.
    partials = jnp.sum(acc, axis=(2, 3))                  # (B, 3)
    inter = partials[:, 0]
    card = partials[:, 1]
    sse = partials[:, 2]

    mse = jnp.sum(sse) / jnp.float32(B * N)               # mean over all elems
    dice_score = 2.0 * inter / (card + _EPS)
    dice = jnp.mean(1.0 - dice_score)
    return (mse + dice) / 2.0


def _reference(pred, target):
    p = pred.astype(jnp.float32)
    t = target.astype(jnp.float32)
    mse = jnp.mean((p - t) ** 2)
    s = jax.nn.sigmoid(p)
    dims = (1, 2, 3)
    inter = jnp.sum(s * t, axis=dims)
    card = jnp.sum(s + t, axis=dims)
    dice = jnp.mean(1.0 - 2.0 * inter / (card + _EPS))
    return (mse + dice) / 2.0


if __name__ == "__main__":
    key = jax.random.PRNGKey(0)
    loss_fn = jax.jit(mse_dice_loss)

    def run_case(shape, k):
        k1, k2 = jax.random.split(k)
        pred = jax.random.normal(k1, shape, dtype=jnp.float32)
        # target: binary segmentation-style mask
        target = (jax.random.uniform(k2, shape) > 0.5).astype(jnp.float32)
        loss = jax.block_until_ready(loss_fn(pred, target))
        ref = jax.block_until_ready(_reference(pred, target))
        assert jnp.allclose(loss, ref, atol=1e-4, rtol=1e-4), (shape, loss, ref)

    k0, k1, k2 = jax.random.split(key, 3)
    run_case((2, 4, 16, 16), k0)    # lane-aligned, single step, no masking
    run_case((2, 4, 16, 15), k1)    # N % 128 != 0 -> in-kernel tail masking
    run_case((1, 8, 256, 512), k2)  # multi-step accumulation + strip-mined chunks
    print("KERNEL_OK")
</pallas_src>

<mosaic_0001>
module attributes {stable_mosaic.version = 11 : i64} {
  func.func @kernel(%arg0: i32, %arg1: i32, %arg2: memref<1x8x128xf32, #tpu.memory_space<vmem>>, %arg3: memref<1x8x128xf32, #tpu.memory_space<vmem>>, %arg4: memref<1x3x8x128xf32, #tpu.memory_space<vmem>>) attributes {dimension_semantics = [#tpu.dimension_semantics<parallel>, #tpu.dimension_semantics<arbitrary>], iteration_bounds = array<i64: 2, 1>, scalar_prefetch = 0 : i64, scratch_operands = 0 : i64, tpu.core_type = #tpu.core_type<tc>, window_params = [{transform_indices = @transform_0, window_bounds = array<i64: 1, 8, 128>}, {transform_indices = @transform_1, window_bounds = array<i64: 1, 8, 128>}, {transform_indices = @transform_2, window_bounds = array<i64: 1, 3, 8, 128>}]} {
    %c0_i32 = arith.constant 0 : i32
    %0 = arith.cmpi eq, %arg1, %c0_i32 : i32
    %1 = arith.extui %0 : i1 to i32
    %c0_i32_0 = arith.constant 0 : i32
    %2 = arith.cmpi ne, %1, %c0_i32_0 : i32
    scf.if %2 {
      %cst_33 = arith.constant 0.000000e+00 : f32
      %50 = vector.broadcast %cst_33 : f32 to vector<1x3x8x128xf32>
      %c0_34 = arith.constant 0 : index
      %c0_35 = arith.constant 0 : index
      %c0_36 = arith.constant 0 : index
      %c0_37 = arith.constant 0 : index
      %51 = vector.load %arg4[%c0_34, %c0_35, %c0_36, %c0_37] : memref<1x3x8x128xf32, #tpu.memory_space<vmem>>, vector<1x3x8x128xf32>
      tpu.vector_store %arg4[%c0_34, %c0_35, %c0_36, %c0_37], %50 {strides = array<i32>} : memref<1x3x8x128xf32, #tpu.memory_space<vmem>>, vector<1x3x8x128xf32>,
    } else {
    }
    %cst = arith.constant 0.000000e+00 : f32
    %3 = vector.broadcast %cst : f32 to vector<8x128xf32>
    %c0_i32_1 = arith.constant 0 : i32
    %c8_i32 = arith.constant 8 : i32
    %4 = arith.muli %c0_i32_1, %c8_i32 : i32
    %5 = tpu.assume_multiple %4, 8 : i32
    %c0 = arith.constant 0 : index
    %6 = arith.index_cast %5 : i32 to index
    %c0_2 = arith.constant 0 : index
    %7 = vector.load %arg2[%c0, %6, %c0_2] : memref<1x8x128xf32, #tpu.memory_space<vmem>>, vector<1x8x128xf32>
    %8 = vector.shape_cast %7 : vector<1x8x128xf32> to vector<8x128xf32>
    %c0_3 = arith.constant 0 : index
    %9 = arith.index_cast %5 : i32 to index
    %c0_4 = arith.constant 0 : index
    %10 = vector.load %arg3[%c0_3, %9, %c0_4] : memref<1x8x128xf32, #tpu.memory_space<vmem>>, vector<1x8x128xf32>
    %11 = vector.shape_cast %10 : vector<1x8x128xf32> to vector<8x128xf32>
    %cst_5 = arith.constant 5.000000e-01 : f32
    %12 = vector.broadcast %cst_5 : f32 to vector<8x128xf32>
    %13 = arith.mulf %12, %8 : vector<8x128xf32>
    %14 = math.tanh %13 : vector<8x128xf32>
    %cst_6 = arith.constant 5.000000e-01 : f32
    %15 = vector.broadcast %cst_6 : f32 to vector<8x128xf32>
    %16 = arith.mulf %15, %14 : vector<8x128xf32>
    %cst_7 = arith.constant 5.000000e-01 : f32
    %17 = vector.broadcast %cst_7 : f32 to vector<8x128xf32>
    %18 = arith.addf %16, %17 : vector<8x128xf32>
    %19 = arith.subf %8, %11 : vector<8x128xf32>
    %20 = arith.mulf %18, %11 : vector<8x128xf32>
    %21 = vector.shape_cast %20 : vector<8x128xf32> to vector<1x8x128xf32>
    %cst_8 = arith.constant dense<0.000000e+00> : vector<8x128xf32>
    %22 = vector.multi_reduction <add>, %21, %cst_8 [0] : vector<1x8x128xf32> to vector<8x128xf32>
    %23 = arith.addf %3, %22 : vector<8x128xf32>
    %24 = arith.addf %18, %11 : vector<8x128xf32>
    %25 = vector.shape_cast %24 : vector<8x128xf32> to vector<1x8x128xf32>
    %cst_9 = arith.constant dense<0.000000e+00> : vector<8x128xf32>
    %26 = vector.multi_reduction <add>, %25, %cst_9 [0] : vector<1x8x128xf32> to vector<8x128xf32>
    %27 = arith.addf %3, %26 : vector<8x128xf32>
    %28 = arith.mulf %19, %19 : vector<8x128xf32>
    %29 = vector.shape_cast %28 : vector<8x128xf32> to vector<1x8x128xf32>
    %cst_10 = arith.constant dense<0.000000e+00> : vector<8x128xf32>
    %30 = vector.multi_reduction <add>, %29, %cst_10 [0] : vector<1x8x128xf32> to vector<8x128xf32>
    %31 = arith.addf %3, %30 : vector<8x128xf32>
    %c1_i32 = arith.constant 1 : i32
    %c0_11 = arith.constant 0 : index
    %c0_12 = arith.constant 0 : index
    %c0_13 = arith.constant 0 : index
    %c0_14 = arith.constant 0 : index
    %32 = vector.load %arg4[%c0_11, %c0_12, %c0_13, %c0_14] : memref<1x3x8x128xf32, #tpu.memory_space<vmem>>, vector<1x1x8x128xf32>
    %33 = vector.shape_cast %32 : vector<1x1x8x128xf32> to vector<8x128xf32>
    %34 = arith.addf %33, %23 : vector<8x128xf32>
    %c0_15 = arith.constant 0 : index
    %c0_16 = arith.constant 0 : index
    %c0_17 = arith.constant 0 : index
    %c0_18 = arith.constant 0 : index
    %35 = vector.load %arg4[%c0_15, %c0_16, %c0_17, %c0_18] : memref<1x3x8x128xf32, #tpu.memory_space<vmem>>, vector<1x1x8x128xf32>
    %36 = vector.shape_cast %35 : vector<1x1x8x128xf32> to vector<8x128xf32>
    %37 = vector.shape_cast %34 : vector<8x128xf32> to vector<1x1x8x128xf32>
    tpu.vector_store %arg4[%c0_15, %c0_16, %c0_17, %c0_18], %37 {strides = array<i32>} : memref<1x3x8x128xf32, #tpu.memory_space<vmem>>, vector<1x1x8x128xf32>,
    %c0_19 = arith.constant 0 : index
    %c1 = arith.constant 1 : index
    %c0_20 = arith.constant 0 : index
    %c0_21 = arith.constant 0 : index
    %38 = vector.load %arg4[%c0_19, %c1, %c0_20, %c0_21] : memref<1x3x8x128xf32, #tpu.memory_space<vmem>>, vector<1x1x8x128xf32>
    %39 = vector.shape_cast %38 : vector<1x1x8x128xf32> to vector<8x128xf32>
    %40 = arith.addf %39, %27 : vector<8x128xf32>
    %c0_22 = arith.constant 0 : index
    %c1_23 = arith.constant 1 : index
    %c0_24 = arith.constant 0 : index
    %c0_25 = arith.constant 0 : index
    %41 = vector.load %arg4[%c0_22, %c1_23, %c0_24, %c0_25] : memref<1x3x8x128xf32, #tpu.memory_space<vmem>>, vector<1x1x8x128xf32>
    %42 = vector.shape_cast %41 : vector<1x1x8x128xf32> to vector<8x128xf32>
    %43 = vector.shape_cast %40 : vector<8x128xf32> to vector<1x1x8x128xf32>
    tpu.vector_store %arg4[%c0_22, %c1_23, %c0_24, %c0_25], %43 {strides = array<i32>} : memref<1x3x8x128xf32, #tpu.memory_space<vmem>>, vector<1x1x8x128xf32>,
    %c0_26 = arith.constant 0 : index
    %c2 = arith.constant 2 : index
    %c0_27 = arith.constant 0 : index
    %c0_28 = arith.constant 0 : index
    %44 = vector.load %arg4[%c0_26, %c2, %c0_27, %c0_28] : memref<1x3x8x128xf32, #tpu.memory_space<vmem>>, vector<1x1x8x128xf32>
    %45 = vector.shape_cast %44 : vector<1x1x8x128xf32> to vector<8x128xf32>
    %46 = arith.addf %45, %31 : vector<8x128xf32>
    %c0_29 = arith.constant 0 : index
    %c2_30 = arith.constant 2 : index
    %c0_31 = arith.constant 0 : index
    %c0_32 = arith.constant 0 : index
    %47 = vector.load %arg4[%c0_29, %c2_30, %c0_31, %c0_32] : memref<1x3x8x128xf32, #tpu.memory_space<vmem>>, vector<1x1x8x128xf32>
    %48 = vector.shape_cast %47 : vector<1x1x8x128xf32> to vector<8x128xf32>
    %49 = vector.shape_cast %46 : vector<8x128xf32> to vector<1x1x8x128xf32>
    tpu.vector_store %arg4[%c0_29, %c2_30, %c0_31, %c0_32], %49 {strides = array<i32>} : memref<1x3x8x128xf32, #tpu.memory_space<vmem>>, vector<1x1x8x128xf32>,
    return
  }
  func.func @transform_0(%arg0: i32, %arg1: i32) -> (i32, i32, i32) {
    %c0_i32 = arith.constant 0 : i32
    %c0_i32_0 = arith.constant 0 : i32
    return %arg0, %arg1, %c0_i32 : i32, i32, i32
  }
  func.func @transform_1(%arg0: i32, %arg1: i32) -> (i32, i32, i32) {
    %c0_i32 = arith.constant 0 : i32
    %c0_i32_0 = arith.constant 0 : i32
    return %arg0, %arg1, %c0_i32 : i32, i32, i32
  }
  func.func @transform_2(%arg0: i32, %arg1: i32) -> (i32, i32, i32, i32) {
    %c0_i32 = arith.constant 0 : i32
    %c0_i32_0 = arith.constant 0 : i32
    %c0_i32_1 = arith.constant 0 : i32
    %c0_i32_2 = arith.constant 0 : i32
    return %arg0, %c0_i32, %c0_i32_0, %c0_i32_1 : i32, i32, i32, i32
  }
}

</mosaic_0001>

<bundles_post_ra>
// kernel: mse_dice_loss.1
= control target key start
LH: loop header
LB: loop body
LE: loop exit
PB: predicated region body
PF: predicated region fallthrough
CT: control target
= control target key end

     0   :  { %s388_s9 = smov 0   ;;  %s390_s10 = smov 0   ;;  %s421_s0 = inlined_call_operand.vmem [shape: f32[2,8,128], index: 0, kind: input, shape index: {}]   ;;  %s422_s1 = inlined_call_operand.vmem [shape: f32[2,8,128], index: 1, kind: input, shape index: {}]   ;;  %s423_s2 = inlined_call_operand.vmem [shape: f32[2,3,8,128], index: 2, kind: output, shape index: {}]  }
   0x1   :  { %s392_s11 = smov 0  }
   0x2 LB: > { %s24_s12 = sadd.s32 1, %s367_s10  ;;  %p311_p0 = scmp.ge.s32.totalorder %s371_s11, 1  ;;  %s371_s11 = sphi %s392_s11, %s12_s11   ;;  %s367_s10 = sphi %s390_s10, %s425_s10   ;;  %s363_s9 = sphi %s388_s9, %s424_s9  }
   0x3   : > { %p26_p1 = scmp.ge.s32.totalorder %s24_s12, 2  ;;  %p142_p2 = scmp.lt.s32.totalorder %s371_s11, 3 }
   0x5   : > { %s427_s12 = smov (%p26_p1, %s24_s12), 0  ;;  %p143_p3 = pnand %p311_p0, %p142_p2 }
   0x6   : > { %p173_p4 = scmp.lt.s32.totalorder (!%p143_p3), %s363_s9, 1 }
   0x7   : > { %146 = sbr.rel (%p143_p3) target bundleno = 33 (0x21), region = 28 }
   0xc   : > { %s429_s9 = smov (!%p173_p4, %s363_s9), 1 }
   0xd   : > { %s312_s13 = sshll.u32 %s429_s9, 3  ;;  %s321_s20 = smul.u32 24, %s429_s9 }
   0xe   : > { %s179_s16 = scalar_lea.vmem %s421_s0, %s312_s13  ;;  %s186_s19 = scalar_lea.vmem %s422_s1, %s312_s13 }
   0xf   : > { %v199_v0 = vld [vmem:[%s179_s16] sm:$0xff]  ;;  %s191_s23 = scalar_lea.vmem %s423_s2, %s321_s20 }
  0x10   : > { %v200_v1 = vld [vmem:[%s186_s19] sm:$0xff]  ;;  %v201_v2 = vmul.f32 0.5, %v199_v0 }
  0x11   : > { %v205_v3 = vsub.f32 %v199_v0, %v200_v1 }
  0x12   : > { %347 = vtanh.f32 %v201_v2 }
  0x13   : > { %v212_v4 = vmul.f32 %v205_v3, %v205_v3 }
  0x15   : > { %318 = vst [vmem:[%s191_s23 + $0x10] sm:$0xff] %v212_v4 }
  0x18   : > { %v348_v5 = vpop.eup %347 }
  0x19   : > { %v203_v6 = vmul.f32 0.5, %v348_v5 }
  0x1b   : > { %v204_v7 = vadd.f32 0.5, %v203_v6 }
  0x1d   : > { %v206_v8 = vmul.f32 %v204_v7, %v200_v1  ;;  %v209_v9 = vadd.f32 %v204_v7, %v200_v1 }
  0x1f   : > { %217 = vst [vmem:[%s191_s23] sm:$0xff] %v206_v8 }
  0x20   : > { %316 = vst [vmem:[%s191_s23 + $0x8] sm:$0xff] %v209_v9 }
  0x21 PF: > { %s12_s11 = sadd.s32 1, %s371_s11   ;;  %s424_s9 = smov %s367_s10 }
  0x22   : > { %p9_p5 = scmp.ge.s32.totalorder %s12_s11, 4   ;;  %s425_s10 = smov %s427_s12 }
  0x24   :  { %11 = sbr.rel (!%p9_p5) target bundleno = 2 (0x2), region = 67 }

</bundles_post_ra>
